<compile_context>
chip_gen: v5e
topology: v5e:2x2
jax: 0.10.0
libtpu: 0.0.40
codegen_flags: <defaults>
</compile_context>

<pallas_src>
import math

import jax
import jax.numpy as jnp
import numpy as np
from jax.experimental import pallas as pl
from jax.experimental.pallas import tpu as pltpu


def _round_up(x, m):
    return (x + m - 1) // m * m


def _cdiv(a, b):
    return -(-a // b)


# Batch rows per register-blocked sub-tile.  Multiple of 16 keeps bf16 sublane
# packing unmasked; small enough that C per-channel slabs + accumulators stay
# vreg-resident for typical EEG channel counts.
_SUB = 16


def _vmem_plan():
    """Per-generation (per-buffer byte budget, scoped vmem_limit_bytes)."""
    try:
        vmem_cap = int(pltpu.get_tpu_info().vmem_capacity_bytes)
    except Exception:
        vmem_cap = 64 * 1024 * 1024                      # conservative fallback
    if vmem_cap >= 100 * 1024 * 1024:                    # v5e / v6e: 128 MiB VMEM
        return 20 * 1024 * 1024, 64 * 1024 * 1024
    return 8 * 1024 * 1024, 32 * 1024 * 1024             # v7x: 64 MiB physical


def _choose_batch_tile(B, row_bytes, budget_bytes):
    """Largest batch tile (multiple of _SUB) that fits the per-buffer budget,
    split into >= 2 grid steps when possible (v7x dual-TensorCore), preferring a
    tile that divides the (16-rounded) batch so the wrapper never pads x."""
    b_req = _round_up(B, _SUB)
    tb = max(_SUB, (budget_bytes // max(row_bytes, 1)) // _SUB * _SUB)
    tb = min(tb, b_req)
    if b_req > _SUB:                                      # >= 2 steps when batch allows
        tb = min(tb, _round_up(_cdiv(b_req, 2), _SUB))
    best = tb
    cand = tb
    while cand >= max(_SUB, tb // 2):                     # hunt for an exact divisor
        if b_req % cand == 0:
            best = cand
            break
        cand -= _SUB
    tb = best
    n_tiles = _cdiv(b_req, tb)
    return tb, n_tiles * tb


def _make_kernel(C, K, P, T, Wc, Wm):
    """Fused conv -> maxpool -> classifier kernel for static geometry."""

    def kernel(x_ref, w1_ref, b1_ref, w2_ref, b2_ref, out_ref):
        # x_ref  : (TB, C*T)      VMEM  native-layout batch tile (f32 or bf16)
        # w1_ref : (C*K,)         SMEM  flat first-conv weights (f32)
        # b1_ref : (1,)           SMEM  first-conv bias (f32)
        # w2_ref : (Wm, 128)      VMEM  sparse classifier matrix, bf16 (rows j*P)
        # b2_ref : (1, 128)       VMEM  padded classifier bias (f32)
        # out_ref: (TB, 128)      VMEM  lane-dense logits tile (f32)
        TB = out_ref.shape[0]
        n_sub = TB // _SUB

        # Loop-invariant scalars / small tensors hoisted out of the sub-tile loop.
        w1 = [w1_ref[i] for i in range(C * K)]
        w2 = w2_ref[...]                                   # ~Wm*128*2 bytes
        b2 = b2_ref[...]
        acc0 = jnp.zeros((_SUB, Wc), jnp.float32) + b1_ref[0]

        def sub_tile(s, carry):
            row = pl.multiple_of(s * _SUB, _SUB)
            rows = pl.ds(row, _SUB)

            # Per-channel (SUB, T) slabs: each channel is read once and upcast to
            # f32 (widening cast only -> fine on v5e which has no bf16 VALU).
            xs = [x_ref[rows, pl.ds(c * T, T)].astype(jnp.float32)
                  for c in range(C)]

            # Conv1d(C -> 1, K), valid padding, channel sum hoisted inside each tap
            # so there are only K lane shifts (not C*K); everything stays in vregs.
            acc = acc0
            for k in range(K):
                part = xs[0] * w1[k]
                for c in range(1, C):
                    part = part + xs[c] * w1[c * K + k]
                acc = acc + part[:, k:k + Wc]

            # MaxPool1d(P, P) as a sliding-window max; only positions j*P are used
            # downstream (selected by the sparse classifier matrix).
            m = acc[:, 0:Wm]
            for p in range(1, P):
                m = jnp.maximum(m, acc[:, p:p + Wm])

            # Classifier Conv1d(1 -> n_classes, L2) + stride-P selection as one
            # bf16 MXU matmul (f32 accumulation).
            logits = jnp.dot(m.astype(jnp.bfloat16), w2,
                             preferred_element_type=jnp.float32)
            out_ref[rows, :] = logits + b2
            return carry

        jax.lax.fori_loop(0, n_sub, sub_tile, 0, unroll=(n_sub <= 8))

    return kernel


def simpleconv_fullyconv_forward(x, conv_w, conv_b, cls_w, cls_b, *, pool_stride):
    """x: (B, C, T) float32/bfloat16 (PyTorch NCL).  Returns squeezed logits."""
    B, C, T = x.shape
    _, _, K = conv_w.shape            # (1, C, K)
    NCLS, _, K2 = cls_w.shape         # (NCLS, 1, K2)
    P = int(pool_stride)
    L1 = T - K + 1
    L2 = L1 // P
    assert K2 == L2, "conv_class kernel must span the whole pooled signal"

    NCLS_pad = _round_up(NCLS, 128)   # lane-dense output stores
    Wm = (L2 - 1) * P + 1             # sliding-max width (matmul contraction dim)
    Wc = L2 * P                       # conv accumulator width actually needed
    # Geometry invariants: every acc/m position the kernel touches is a valid conv
    # output, so no padding garbage can ever reach a real logit.
    assert Wc <= L1 and (K - 1) + Wc <= T and (P - 1) + Wm <= Wc

    itemsize = jnp.dtype(x.dtype).itemsize
    budget, vmem_limit = _vmem_plan()
    row_bytes = C * T * itemsize + NCLS_pad * 4           # x row + out row
    TB, B_out = _choose_batch_tile(B, row_bytes, budget)

    # Native layout, zero-copy flatten of (C, T) -> C*T lanes.  Only the batch axis
    # is padded, and only when the chosen tile does not divide it.
    x2 = x.reshape(B, C * T)
    if B_out != B:
        x2 = jnp.pad(x2, ((0, B_out - B), (0, 0)))

    w1_flat = conv_w[0].astype(jnp.float32).reshape(C * K)            # SMEM
    b1 = conv_b.astype(jnp.float32).reshape(1)                        # SMEM
    # Sparse classifier matrix: row j*P holds cls_w[:, 0, j]; all other rows zero.
    w2_full = jnp.zeros((Wm, NCLS_pad), jnp.float32)
    w2_full = w2_full.at[jnp.arange(L2) * P, :NCLS].set(
        cls_w[:, 0, :].astype(jnp.float32).T).astype(jnp.bfloat16)
    b2_full = jnp.zeros((1, NCLS_pad), jnp.float32).at[0, :NCLS].set(
        cls_b.astype(jnp.float32))

    flops = 2 * B * C * K * L1 + 2 * B * Wm * NCLS_pad
    bytes_accessed = (B_out * C * T * itemsize + B_out * NCLS_pad * 4
                      + Wm * NCLS_pad * 2 + (C * K + 1 + NCLS_pad) * 4)

    grid = (B_out // TB,)
    out_full = pl.pallas_call(
        _make_kernel(C, K, P, T, Wc, Wm),
        out_shape=jax.ShapeDtypeStruct((B_out, NCLS_pad), jnp.float32),
        grid=grid,
        in_specs=[
            pl.BlockSpec((TB, C * T), lambda i: (i, 0)),              # x tile (VMEM)
            pl.BlockSpec(memory_space=pltpu.MemorySpace.SMEM),        # w1 (flat)
            pl.BlockSpec(memory_space=pltpu.MemorySpace.SMEM),        # b1
            pl.BlockSpec((Wm, NCLS_pad), lambda i: (0, 0)),           # w2 (resident)
            pl.BlockSpec((1, NCLS_pad), lambda i: (0, 0)),            # b2 (resident)
        ],
        out_specs=pl.BlockSpec((TB, NCLS_pad), lambda i: (i, 0)),
        compiler_params=pltpu.CompilerParams(
            dimension_semantics=("parallel",),
            vmem_limit_bytes=vmem_limit,
        ),
        cost_estimate=pl.CostEstimate(
            flops=flops, transcendentals=0, bytes_accessed=bytes_accessed),
    )(x2, w1_flat, b1, w2_full, b2_full)

    out = out_full[:B, :NCLS]
    # mimic torch's .squeeze() on the (B, NCLS, 1) conv output
    return jnp.squeeze(out[..., None])


def _ref_forward(x, conv_w, conv_b, cls_w, cls_b, pool_stride):
    """Independent pure-JAX reference (f32, HIGHEST precision convs)."""
    hp = jax.lax.Precision.HIGHEST
    dn1 = jax.lax.conv_dimension_numbers(x.shape, conv_w.shape, ("NCH", "OIH", "NCH"))
    y = jax.lax.conv_general_dilated(x, conv_w, (1,), "VALID",
                                     dimension_numbers=dn1, precision=hp)
    y = y + conv_b[None, :, None]
    y = jax.lax.reduce_window(
        y, -jnp.inf, jax.lax.max,
        (1, 1, pool_stride), (1, 1, pool_stride), "VALID")
    dn2 = jax.lax.conv_dimension_numbers(y.shape, cls_w.shape, ("NCH", "OIH", "NCH"))
    z = jax.lax.conv_general_dilated(y, cls_w, (1,), "VALID",
                                     dimension_numbers=dn2, precision=hp)
    z = z + cls_b[None, :, None]
    return jnp.squeeze(z)


if __name__ == "__main__":
    # small shapes consistent with the module
    B, n_channels, n_points = 4, 4, 64
    kernel_size, pool_stride, n_classes = 8, 4, 2
    L1 = n_points - kernel_size + 1          # 57
    K2 = L1 // pool_stride                   # 14 (= conv_class kernel size)

    key = jax.random.PRNGKey(0)
    kx, kw1, kb1, kw2, kb2 = jax.random.split(key, 5)

    # bf16 input stream (halves HBM bytes for the dominant stream); the kernel
    # upcasts to f32 internally, so numerics follow f32 accumulation.
    x = jax.random.normal(kx, (B, n_channels, n_points),
                          dtype=jnp.float32).astype(jnp.bfloat16)

    # deterministic parameter init mirroring nn.Conv1d defaults (uniform +/- 1/sqrt(fan_in))
    bound1 = 1.0 / math.sqrt(n_channels * kernel_size)
    conv_w = jax.random.uniform(kw1, (1, n_channels, kernel_size),
                                minval=-bound1, maxval=bound1, dtype=jnp.float32)
    conv_b = jax.random.uniform(kb1, (1,), minval=-bound1, maxval=bound1,
                                dtype=jnp.float32)
    bound2 = 1.0 / math.sqrt(1 * K2)
    cls_w = jax.random.uniform(kw2, (n_classes, 1, K2),
                               minval=-bound2, maxval=bound2, dtype=jnp.float32)
    cls_b = jax.random.uniform(kb2, (n_classes,), minval=-bound2, maxval=bound2,
                               dtype=jnp.float32)

    out = simpleconv_fullyconv_forward(x, conv_w, conv_b, cls_w, cls_b,
                                       pool_stride=pool_stride)
    out = jax.block_until_ready(out)

    ref = _ref_forward(x.astype(jnp.float32), conv_w, conv_b, cls_w, cls_b,
                       pool_stride)
    # classifier matmul runs with bf16 MXU inputs (documented, looser tolerance)
    np.testing.assert_allclose(np.asarray(out), np.asarray(ref),
                               rtol=3e-2, atol=3e-2)

    print("KERNEL_OK")
</pallas_src>

<mosaic_0001>
module attributes {stable_mosaic.version = 11 : i64} {
  func.func @kernel(%arg0: i32, %arg1: memref<16x256xbf16, #tpu.memory_space<vmem>>, %arg2: memref<32xf32, #tpu.memory_space<smem>>, %arg3: memref<1xf32, #tpu.memory_space<smem>>, %arg4: memref<53x128xbf16, #tpu.memory_space<vmem>>, %arg5: memref<1x128xf32, #tpu.memory_space<vmem>>, %arg6: memref<16x128xf32, #tpu.memory_space<vmem>>) attributes {dimension_semantics = [#tpu.dimension_semantics<parallel>], iteration_bounds = array<i64: 1>, scalar_prefetch = 0 : i64, scratch_operands = 0 : i64, tpu.core_type = #tpu.core_type<tc>, window_params = [{transform_indices = @transform_0, window_bounds = array<i64: 16, 256>}, {transform_indices = @transform_1, window_bounds = array<i64: 32>}, {transform_indices = @transform_2, window_bounds = array<i64: 1>}, {pipeline_mode = #tpu.pipeline_mode<synchronous>, transform_indices = @transform_3, window_bounds = array<i64: 53, 128>}, {pipeline_mode = #tpu.pipeline_mode<synchronous>, transform_indices = @transform_4, window_bounds = array<i64: 1, 128>}, {transform_indices = @transform_5, window_bounds = array<i64: 16, 128>}]} {
    %c0 = arith.constant 0 : index
    %0 = memref.load %arg2[%c0] : memref<32xf32, #tpu.memory_space<smem>>
    %c1 = arith.constant 1 : index
    %1 = memref.load %arg2[%c1] : memref<32xf32, #tpu.memory_space<smem>>
    %c2 = arith.constant 2 : index
    %2 = memref.load %arg2[%c2] : memref<32xf32, #tpu.memory_space<smem>>
    %c3 = arith.constant 3 : index
    %3 = memref.load %arg2[%c3] : memref<32xf32, #tpu.memory_space<smem>>
    %c4 = arith.constant 4 : index
    %4 = memref.load %arg2[%c4] : memref<32xf32, #tpu.memory_space<smem>>
    %c5 = arith.constant 5 : index
    %5 = memref.load %arg2[%c5] : memref<32xf32, #tpu.memory_space<smem>>
    %c6 = arith.constant 6 : index
    %6 = memref.load %arg2[%c6] : memref<32xf32, #tpu.memory_space<smem>>
    %c7 = arith.constant 7 : index
    %7 = memref.load %arg2[%c7] : memref<32xf32, #tpu.memory_space<smem>>
    %c8 = arith.constant 8 : index
    %8 = memref.load %arg2[%c8] : memref<32xf32, #tpu.memory_space<smem>>
    %c9 = arith.constant 9 : index
    %9 = memref.load %arg2[%c9] : memref<32xf32, #tpu.memory_space<smem>>
    %c10 = arith.constant 10 : index
    %10 = memref.load %arg2[%c10] : memref<32xf32, #tpu.memory_space<smem>>
    %c11 = arith.constant 11 : index
    %11 = memref.load %arg2[%c11] : memref<32xf32, #tpu.memory_space<smem>>
    %c12 = arith.constant 12 : index
    %12 = memref.load %arg2[%c12] : memref<32xf32, #tpu.memory_space<smem>>
    %c13 = arith.constant 13 : index
    %13 = memref.load %arg2[%c13] : memref<32xf32, #tpu.memory_space<smem>>
    %c14 = arith.constant 14 : index
    %14 = memref.load %arg2[%c14] : memref<32xf32, #tpu.memory_space<smem>>
    %c15 = arith.constant 15 : index
    %15 = memref.load %arg2[%c15] : memref<32xf32, #tpu.memory_space<smem>>
    %c16 = arith.constant 16 : index
    %16 = memref.load %arg2[%c16] : memref<32xf32, #tpu.memory_space<smem>>
    %c17 = arith.constant 17 : index
    %17 = memref.load %arg2[%c17] : memref<32xf32, #tpu.memory_space<smem>>
    %c18 = arith.constant 18 : index
    %18 = memref.load %arg2[%c18] : memref<32xf32, #tpu.memory_space<smem>>
    %c19 = arith.constant 19 : index
    %19 = memref.load %arg2[%c19] : memref<32xf32, #tpu.memory_space<smem>>
    %c20 = arith.constant 20 : index
    %20 = memref.load %arg2[%c20] : memref<32xf32, #tpu.memory_space<smem>>
    %c21 = arith.constant 21 : index
    %21 = memref.load %arg2[%c21] : memref<32xf32, #tpu.memory_space<smem>>
    %c22 = arith.constant 22 : index
    %22 = memref.load %arg2[%c22] : memref<32xf32, #tpu.memory_space<smem>>
    %c23 = arith.constant 23 : index
    %23 = memref.load %arg2[%c23] : memref<32xf32, #tpu.memory_space<smem>>
    %c24 = arith.constant 24 : index
    %24 = memref.load %arg2[%c24] : memref<32xf32, #tpu.memory_space<smem>>
    %c25 = arith.constant 25 : index
    %25 = memref.load %arg2[%c25] : memref<32xf32, #tpu.memory_space<smem>>
    %c26 = arith.constant 26 : index
    %26 = memref.load %arg2[%c26] : memref<32xf32, #tpu.memory_space<smem>>
    %c27 = arith.constant 27 : index
    %27 = memref.load %arg2[%c27] : memref<32xf32, #tpu.memory_space<smem>>
    %c28 = arith.constant 28 : index
    %28 = memref.load %arg2[%c28] : memref<32xf32, #tpu.memory_space<smem>>
    %c29 = arith.constant 29 : index
    %29 = memref.load %arg2[%c29] : memref<32xf32, #tpu.memory_space<smem>>
    %c30 = arith.constant 30 : index
    %30 = memref.load %arg2[%c30] : memref<32xf32, #tpu.memory_space<smem>>
    %c31 = arith.constant 31 : index
    %31 = memref.load %arg2[%c31] : memref<32xf32, #tpu.memory_space<smem>>
    %c0_0 = arith.constant 0 : index
    %c0_1 = arith.constant 0 : index
    %32 = vector.load %arg4[%c0_0, %c0_1] : memref<53x128xbf16, #tpu.memory_space<vmem>>, vector<53x128xbf16>
    %c0_2 = arith.constant 0 : index
    %c0_3 = arith.constant 0 : index
    %33 = vector.load %arg5[%c0_2, %c0_3] : memref<1x128xf32, #tpu.memory_space<vmem>>, vector<1x128xf32>
    %cst = arith.constant 0.000000e+00 : f32
    %34 = vector.broadcast %cst : f32 to vector<16x56xf32>
    %c0_4 = arith.constant 0 : index
    %35 = memref.load %arg3[%c0_4] : memref<1xf32, #tpu.memory_space<smem>>
    %36 = vector.broadcast %35 : f32 to vector<16x56xf32>
    %37 = arith.addf %34, %36 : vector<16x56xf32>
    %c0_i32 = arith.constant 0 : i32
    %c16_i32 = arith.constant 16 : i32
    %38 = arith.muli %c0_i32, %c16_i32 : i32
    %39 = tpu.assume_multiple %38, 16 : i32
    %40 = arith.index_cast %39 : i32 to index
    %c0_5 = arith.constant 0 : index
    %41 = vector.load %arg1[%40, %c0_5] : memref<16x256xbf16, #tpu.memory_space<vmem>>, vector<16x64xbf16>
    %42 = arith.extf %41 : vector<16x64xbf16> to vector<16x64xf32>
    %43 = arith.index_cast %39 : i32 to index
    %c64 = arith.constant 64 : index
    %44 = vector.load %arg1[%43, %c64] : memref<16x256xbf16, #tpu.memory_space<vmem>>, vector<16x64xbf16>
    %45 = arith.extf %44 : vector<16x64xbf16> to vector<16x64xf32>
    %46 = arith.index_cast %39 : i32 to index
    %c128 = arith.constant 128 : index
    %47 = vector.load %arg1[%46, %c128] : memref<16x256xbf16, #tpu.memory_space<vmem>>, vector<16x64xbf16>
    %48 = arith.extf %47 : vector<16x64xbf16> to vector<16x64xf32>
    %49 = arith.index_cast %39 : i32 to index
    %c192 = arith.constant 192 : index
    %50 = vector.load %arg1[%49, %c192] : memref<16x256xbf16, #tpu.memory_space<vmem>>, vector<16x64xbf16>
    %51 = arith.extf %50 : vector<16x64xbf16> to vector<16x64xf32>
    %52 = vector.broadcast %0 : f32 to vector<16x64xf32>
    %53 = arith.mulf %42, %52 : vector<16x64xf32>
    %54 = vector.broadcast %8 : f32 to vector<16x64xf32>
    %55 = arith.mulf %45, %54 : vector<16x64xf32>
    %56 = arith.addf %53, %55 : vector<16x64xf32>
    %57 = vector.broadcast %16 : f32 to vector<16x64xf32>
    %58 = arith.mulf %48, %57 : vector<16x64xf32>
    %59 = arith.addf %56, %58 : vector<16x64xf32>
    %60 = vector.broadcast %24 : f32 to vector<16x64xf32>
    %61 = arith.mulf %51, %60 : vector<16x64xf32>
    %62 = arith.addf %59, %61 : vector<16x64xf32>
    %63 = vector.extract_strided_slice %62 {offsets = [0, 0], sizes = [16, 56], strides = [1, 1]} : vector<16x64xf32> to vector<16x56xf32>
    %64 = arith.addf %37, %63 : vector<16x56xf32>
    %65 = vector.broadcast %1 : f32 to vector<16x64xf32>
    %66 = arith.mulf %42, %65 : vector<16x64xf32>
    %67 = vector.broadcast %9 : f32 to vector<16x64xf32>
    %68 = arith.mulf %45, %67 : vector<16x64xf32>
    %69 = arith.addf %66, %68 : vector<16x64xf32>
    %70 = vector.broadcast %17 : f32 to vector<16x64xf32>
    %71 = arith.mulf %48, %70 : vector<16x64xf32>
    %72 = arith.addf %69, %71 : vector<16x64xf32>
    %73 = vector.broadcast %25 : f32 to vector<16x64xf32>
    %74 = arith.mulf %51, %73 : vector<16x64xf32>
    %75 = arith.addf %72, %74 : vector<16x64xf32>
    %76 = vector.extract_strided_slice %75 {offsets = [0, 1], sizes = [16, 56], strides = [1, 1]} : vector<16x64xf32> to vector<16x56xf32>
    %77 = arith.addf %64, %76 : vector<16x56xf32>
    %78 = vector.broadcast %2 : f32 to vector<16x64xf32>
    %79 = arith.mulf %42, %78 : vector<16x64xf32>
    %80 = vector.broadcast %10 : f32 to vector<16x64xf32>
    %81 = arith.mulf %45, %80 : vector<16x64xf32>
    %82 = arith.addf %79, %81 : vector<16x64xf32>
    %83 = vector.broadcast %18 : f32 to vector<16x64xf32>
    %84 = arith.mulf %48, %83 : vector<16x64xf32>
    %85 = arith.addf %82, %84 : vector<16x64xf32>
    %86 = vector.broadcast %26 : f32 to vector<16x64xf32>
    %87 = arith.mulf %51, %86 : vector<16x64xf32>
    %88 = arith.addf %85, %87 : vector<16x64xf32>
    %89 = vector.extract_strided_slice %88 {offsets = [0, 2], sizes = [16, 56], strides = [1, 1]} : vector<16x64xf32> to vector<16x56xf32>
    %90 = arith.addf %77, %89 : vector<16x56xf32>
    %91 = vector.broadcast %3 : f32 to vector<16x64xf32>
    %92 = arith.mulf %42, %91 : vector<16x64xf32>
    %93 = vector.broadcast %11 : f32 to vector<16x64xf32>
    %94 = arith.mulf %45, %93 : vector<16x64xf32>
    %95 = arith.addf %92, %94 : vector<16x64xf32>
    %96 = vector.broadcast %19 : f32 to vector<16x64xf32>
    %97 = arith.mulf %48, %96 : vector<16x64xf32>
    %98 = arith.addf %95, %97 : vector<16x64xf32>
    %99 = vector.broadcast %27 : f32 to vector<16x64xf32>
    %100 = arith.mulf %51, %99 : vector<16x64xf32>
    %101 = arith.addf %98, %100 : vector<16x64xf32>
    %102 = vector.extract_strided_slice %101 {offsets = [0, 3], sizes = [16, 56], strides = [1, 1]} : vector<16x64xf32> to vector<16x56xf32>
    %103 = arith.addf %90, %102 : vector<16x56xf32>
    %104 = vector.broadcast %4 : f32 to vector<16x64xf32>
    %105 = arith.mulf %42, %104 : vector<16x64xf32>
    %106 = vector.broadcast %12 : f32 to vector<16x64xf32>
    %107 = arith.mulf %45, %106 : vector<16x64xf32>
    %108 = arith.addf %105, %107 : vector<16x64xf32>
    %109 = vector.broadcast %20 : f32 to vector<16x64xf32>
    %110 = arith.mulf %48, %109 : vector<16x64xf32>
    %111 = arith.addf %108, %110 : vector<16x64xf32>
    %112 = vector.broadcast %28 : f32 to vector<16x64xf32>
    %113 = arith.mulf %51, %112 : vector<16x64xf32>
    %114 = arith.addf %111, %113 : vector<16x64xf32>
    %115 = vector.extract_strided_slice %114 {offsets = [0, 4], sizes = [16, 56], strides = [1, 1]} : vector<16x64xf32> to vector<16x56xf32>
    %116 = arith.addf %103, %115 : vector<16x56xf32>
    %117 = vector.broadcast %5 : f32 to vector<16x64xf32>
    %118 = arith.mulf %42, %117 : vector<16x64xf32>
    %119 = vector.broadcast %13 : f32 to vector<16x64xf32>
    %120 = arith.mulf %45, %119 : vector<16x64xf32>
    %121 = arith.addf %118, %120 : vector<16x64xf32>
    %122 = vector.broadcast %21 : f32 to vector<16x64xf32>
    %123 = arith.mulf %48, %122 : vector<16x64xf32>
    %124 = arith.addf %121, %123 : vector<16x64xf32>
    %125 = vector.broadcast %29 : f32 to vector<16x64xf32>
    %126 = arith.mulf %51, %125 : vector<16x64xf32>
    %127 = arith.addf %124, %126 : vector<16x64xf32>
    %128 = vector.extract_strided_slice %127 {offsets = [0, 5], sizes = [16, 56], strides = [1, 1]} : vector<16x64xf32> to vector<16x56xf32>
    %129 = arith.addf %116, %128 : vector<16x56xf32>
    %130 = vector.broadcast %6 : f32 to vector<16x64xf32>
    %131 = arith.mulf %42, %130 : vector<16x64xf32>
    %132 = vector.broadcast %14 : f32 to vector<16x64xf32>
    %133 = arith.mulf %45, %132 : vector<16x64xf32>
    %134 = arith.addf %131, %133 : vector<16x64xf32>
    %135 = vector.broadcast %22 : f32 to vector<16x64xf32>
    %136 = arith.mulf %48, %135 : vector<16x64xf32>
    %137 = arith.addf %134, %136 : vector<16x64xf32>
    %138 = vector.broadcast %30 : f32 to vector<16x64xf32>
    %139 = arith.mulf %51, %138 : vector<16x64xf32>
    %140 = arith.addf %137, %139 : vector<16x64xf32>
    %141 = vector.extract_strided_slice %140 {offsets = [0, 6], sizes = [16, 56], strides = [1, 1]} : vector<16x64xf32> to vector<16x56xf32>
    %142 = arith.addf %129, %141 : vector<16x56xf32>
    %143 = vector.broadcast %7 : f32 to vector<16x64xf32>
    %144 = arith.mulf %42, %143 : vector<16x64xf32>
    %145 = vector.broadcast %15 : f32 to vector<16x64xf32>
    %146 = arith.mulf %45, %145 : vector<16x64xf32>
    %147 = arith.addf %144, %146 : vector<16x64xf32>
    %148 = vector.broadcast %23 : f32 to vector<16x64xf32>
    %149 = arith.mulf %48, %148 : vector<16x64xf32>
    %150 = arith.addf %147, %149 : vector<16x64xf32>
    %151 = vector.broadcast %31 : f32 to vector<16x64xf32>
    %152 = arith.mulf %51, %151 : vector<16x64xf32>
    %153 = arith.addf %150, %152 : vector<16x64xf32>
    %154 = vector.extract_strided_slice %153 {offsets = [0, 7], sizes = [16, 56], strides = [1, 1]} : vector<16x64xf32> to vector<16x56xf32>
    %155 = arith.addf %142, %154 : vector<16x56xf32>
    %156 = vector.extract_strided_slice %155 {offsets = [0, 0], sizes = [16, 53], strides = [1, 1]} : vector<16x56xf32> to vector<16x53xf32>
    %157 = vector.extract_strided_slice %155 {offsets = [0, 1], sizes = [16, 53], strides = [1, 1]} : vector<16x56xf32> to vector<16x53xf32>
    %158 = arith.maximumf %156, %157 : vector<16x53xf32>
    %159 = vector.extract_strided_slice %155 {offsets = [0, 2], sizes = [16, 53], strides = [1, 1]} : vector<16x56xf32> to vector<16x53xf32>
    %160 = arith.maximumf %158, %159 : vector<16x53xf32>
    %161 = vector.extract_strided_slice %155 {offsets = [0, 3], sizes = [16, 53], strides = [1, 1]} : vector<16x56xf32> to vector<16x53xf32>
    %162 = arith.maximumf %160, %161 : vector<16x53xf32>
    %163 = arith.truncf %162 : vector<16x53xf32> to vector<16x53xbf16>
    %cst_6 = arith.constant dense<0.000000e+00> : vector<16x128xf32>
    %164 = tpu.matmul %163, %32, %cst_6 {dimension_numbers = #tpu.dot_dimension_numbers<[1], [0], [0], [1], [0, 0, 1, 1], [], []>} : vector<16x53xbf16>, vector<53x128xbf16>, vector<16x128xf32> -> vector<16x128xf32>
    %165 = vector.broadcast %33 : vector<1x128xf32> to vector<16x128xf32>
    %166 = arith.addf %164, %165 : vector<16x128xf32>
    %167 = arith.index_cast %39 : i32 to index
    %c0_7 = arith.constant 0 : index
    %168 = vector.load %arg6[%167, %c0_7] : memref<16x128xf32, #tpu.memory_space<vmem>>, vector<16x128xf32>
    tpu.vector_store %arg6[%167, %c0_7], %166 {strides = array<i32>} : memref<16x128xf32, #tpu.memory_space<vmem>>, vector<16x128xf32>,
    %c1_i32 = arith.constant 1 : i32
    return
  }
  func.func @transform_0(%arg0: i32) -> (i32, i32) {
    %c0_i32 = arith.constant 0 : i32
    %c0_i32_0 = arith.constant 0 : i32
    return %arg0, %c0_i32 : i32, i32
  }
  func.func @transform_1(%arg0: i32) -> i32 {
    %c0_i32 = arith.constant 0 : i32
    %c0_i32_0 = arith.constant 0 : i32
    return %c0_i32 : i32
  }
  func.func @transform_2(%arg0: i32) -> i32 {
    %c0_i32 = arith.constant 0 : i32
    %c0_i32_0 = arith.constant 0 : i32
    return %c0_i32 : i32
  }
  func.func @transform_3(%arg0: i32) -> (i32, i32) {
    %c0_i32 = arith.constant 0 : i32
    %c0_i32_0 = arith.constant 0 : i32
    %c0_i32_1 = arith.constant 0 : i32
    return %c0_i32, %c0_i32_0 : i32, i32
  }
  func.func @transform_4(%arg0: i32) -> (i32, i32) {
    %c0_i32 = arith.constant 0 : i32
    %c0_i32_0 = arith.constant 0 : i32
    %c0_i32_1 = arith.constant 0 : i32
    return %c0_i32, %c0_i32_0 : i32, i32
  }
  func.func @transform_5(%arg0: i32) -> (i32, i32) {
    %c0_i32 = arith.constant 0 : i32
    %c0_i32_0 = arith.constant 0 : i32
    return %arg0, %c0_i32 : i32, i32
  }
}

</mosaic_0001>

<bundles_post_ra>
// kernel: tpu_custom_call.1
= control target key start
LH: loop header
LB: loop body
LE: loop exit
PB: predicated region body
PF: predicated region fallthrough
CT: control target
= control target key end

     0   :  { %11 = vsyncpa [#allocation4], 0  ;;  %s951_s0 = inlined_call_operand.hbm [shape: bf16[16,256], index: 0, kind: input, shape index: {}]   ;;  %s952_s1 = inlined_call_operand.vmem [shape: f32[32], index: 1, kind: input, shape index: {}]   ;;  %s953_s2 = inlined_call_operand.<no memory space> [shape: f32[1], index: 2, kind: input, shape index: {}]   ;;  %s954_s3 = inlined_call_operand.hbm [shape: bf16[53,128], index: 3, kind: input, shape index: {}]   ;;  %s955_s4 = inlined_call_operand.vmem [shape: f32[1,128], index: 4, kind: input, shape index: {}]   ;;  %s956_s5 = inlined_call_operand.hbm [shape: f32[16,128], index: 5, kind: output, shape index: {}]  }
   0x1   :  { %12 = vsyncpa [#allocation6], 0 }
   0x2   :  { %13 = vsyncpa [#allocation9], 0 }
   0x3   :  { %14 = vsyncpa [#allocation5], 0  ;;  %s19_s20 = sshll.u32 %s951_s0, 4  ;;  %s745_s21 = smov [#allocation3]   ;;  %s20_s20 = int_to_ptr.hbm [resolvable:$true] %s19_s20 }
   0x4   :  { %s21_s22 = sshll.u32 %s745_s21, 4  ;;  %s33_s25 = sshll.u32 %s952_s1, 4  ;;  %s22_s22 = int_to_ptr.vmem [resolvable:$true] %s21_s22  ;;  %s34_s25 = int_to_ptr.vmem [resolvable:$true] %s33_s25 }
   0x5   :  { %s746_s26 = smov 128   ;;  %s747_s27 = smov 8  }
   0x6   :  { %27 = dma.hbm_to_vmem [thread:$0]  %s20_s20, 256, %s22_s22, [#allocation4], %s746_s26, %s746_s26, %s747_s27  }
   0x7   :  { %s748_s28 = smov [#allocation7]   ;;  %s43_s0 = sshll.u32 %s954_s3, 4  ;;  %s44_s0 = int_to_ptr.hbm [resolvable:$true] %s43_s0 }
   0x8   :  { %36 = dma.vmem_to_smem %s34_s25, 16, %s748_s28, [#allocation6]  }
   0x9   :  { %s749_s6 = smov [#allocation8]   ;;  %s750_s8 = smov 64  }
   0xa   :  { %s45_s7 = sshll.u32 %s749_s6, 4  ;;  %s751_s9 = smov 4   ;;  %s46_s7 = int_to_ptr.vmem [resolvable:$true] %s45_s7 }
   0xb   :  { %51 = dma.hbm_to_vmem [thread:$0]  %s44_s0, 448, %s46_s7, [#allocation9], %s750_s8, %s750_s8, %s751_s9  }
   0xc   :  { %737 = dma.done.wait [#allocation4], 256  }
   0xd   :  { %738 = vsyncadd [#allocation4], 4294967040 }
   0xe   :  { %739 = dma.done.wait [#allocation6], 16  }
   0xf   :  { %740 = vsyncadd [#allocation6], 4294967280 }
  0x10   :  { %741 = dma.done.wait [#allocation9], 448  }
  0x11   :  { %742 = vsyncadd [#allocation9], 4294966848 }
  0x12   :  { %66 = sfence }
  0x13   :  { %s574_s1 = sld [smem:[#allocation7 + $0xa]]  ;;  %v613_v0 = vld [vmem:[#allocation3] sm:$0xff]   ;;  %v620_v4 = vld [vmem:[#allocation3 + $0x8] sm:$0xff]   ;;  %s752_s30 = smov 126   ;;  %vm521_vm0 = vcmask 1041408   ;;  %vm522_vm1 = vcmask 1042432  }
  0x14   :  { %s573_s10 = sld [smem:[#allocation7 + $0x9]]  ;;  %v805_v1 = vunpack.c.l.bf16 %v613_v0  ;;  %v807_v2 = vunpack.c.h.bf16 %v613_v0  ;;  %v812_v9 = vunpack.c.l.bf16 %v620_v4  ;;  %v817_v11 = vunpack.c.h.bf16 %v620_v4  ;;  %s753_s0 = smov 127  }
  0x15   :  { %s589_s3 = sld [smem:[#allocation7 + $0x19]]  ;;  %vm517_vm2 = vcmask 433152  }
  0x16   :  { %s575_s11 = sld [smem:[#allocation7 + $0xb]] }
  0x17   :  { %s590_s12 = sld [smem:[#allocation7 + $0x1a]] }
  0x18   :  { %s576_s13 = sld [smem:[#allocation7 + $0xc]] }
  0x19   :  { %v205_v3 = vstv %s574_s1  ;;  %s591_s14 = sld [smem:[#allocation7 + $0x1b]] }
  0x1a   :  { %v206_v5 = vmul.f32 %v805_v1, %v205_v3  ;;  %v161_v6 = vstv %s573_s10  ;;  %v207_v12 = vmul.f32 %v812_v9, %v205_v3  ;;  %s577_s15 = sld [smem:[#allocation7 + $0xd]] }
  0x1b   :  { %v162_v7 = vmul.f32 %v805_v1, %v161_v6  ;;  %v179_v8 = vstv %s589_s3  ;;  %v163_v13 = vmul.f32 %v812_v9, %v161_v6  ;;  %s592_s16 = sld [smem:[#allocation7 + $0x1c]]  ;;  %s754_s3 = smov 125  }
  0x1c   :  { %210 = vrot.lane.b32.xlu1 %v206_v5, %s750_s8  ;;  %v180_v10 = vmul.f32 %v807_v2, %v179_v8  ;;  %v181_v14 = vmul.f32 %v817_v11, %v179_v8  ;;  %v249_v15 = vstv %s575_s11  ;;  %s578_s17 = sld [smem:[#allocation7 + $0xe]] }
  0x1d   :  { %166 = vrot.lane.b32.xlu0 %v162_v7, %s750_s8  ;;  %v251_v16 = vmul.f32 %v812_v9, %v249_v15  ;;  %v250_v17 = vmul.f32 %v805_v1, %v249_v15  ;;  %v223_v18 = vstv %s590_s12  ;;  %s593_s18 = sld [smem:[#allocation7 + $0x1d]]  ;;  %s755_s12 = smov 123  }
  0x1e   :  { %184 = vrot.lane.b32.xlu2 %v180_v10, %s750_s8  ;;  %v224_v19 = vmul.f32 %v807_v2, %v223_v18  ;;  %v293_v20 = vstv %s576_s13  ;;  %v225_v22 = vmul.f32 %v817_v11, %v223_v18  ;;  %s579_s19 = sld [smem:[#allocation7 + $0xf]]  ;;  %s756_s13 = smov 124  }
  0x1f   :  { %v294_v21 = vmul.f32 %v805_v1, %v293_v20  ;;  %v295_v23 = vmul.f32 %v812_v9, %v293_v20  ;;  %v267_v24 = vstv %s591_s14  ;;  %s594_s20 = sld [smem:[#allocation7 + $0x1e]] }
  0x20   :  { %v269_v25 = vmul.f32 %v817_v11, %v267_v24  ;;  %v268_v26 = vmul.f32 %v807_v2, %v267_v24  ;;  %v337_v27 = vstv %s577_s15  ;;  %s595_s21 = sld [smem:[#allocation7 + $0x1f]] }
  0x21   :  { %v338_v28 = vmul.f32 %v805_v1, %v337_v27  ;;  %v311_v29 = vstv %s592_s16  ;;  %v339_v31 = vmul.f32 %v812_v9, %v337_v27  ;;  %s572_s22 = sld [smem:[#allocation7 + $0x8]] }
  0x22   :  { %v312_v30 = vmul.f32 %v807_v2, %v311_v29  ;;  %v313_v32 = vmul.f32 %v817_v11, %v311_v29  ;;  %v381_v33 = vstv %s578_s17  ;;  %s588_s23 = sld [smem:[#allocation7 + $0x18]]  ;;  %s757_s17 = smov 122  }
  0x23   :  { %v383_v34 = vmul.f32 %v812_v9, %v381_v33  ;;  %v382_v35 = vmul.f32 %v805_v1, %v381_v33  ;;  %v355_v36 = vstv %s593_s18  ;;  %s877_s24 = sld [smem:[#allocation7 + $0x2]]  ;;  %s758_s18 = smov 121  }
  0x24   :  { %212 = vrot.lane.b32.xlu1 %v207_v12, %s750_s8  ;;  %v356_v37 = vmul.f32 %v807_v2, %v355_v36  ;;  %v425_v38 = vstv %s579_s19  ;;  %v357_v40 = vmul.f32 %v817_v11, %v355_v36  ;;  %s565_s25 = sld [smem:[#allocation7 + $0x1]] }
  0x25   :  { %168 = vrot.lane.b32.xlu0 %v163_v13, %s750_s8  ;;  %v426_v39 = vmul.f32 %v805_v1, %v425_v38  ;;  %v427_v41 = vmul.f32 %v812_v9, %v425_v38  ;;  %v399_v42 = vstv %s594_s20  ;;  %s879_s28 = sld [smem:[#allocation7 + $0x12]] }
  0x26   :  { %186 = vrot.lane.b32.xlu2 %v181_v14, %s750_s8  ;;  %v401_v43 = vmul.f32 %v817_v11, %v399_v42  ;;  %v400_v44 = vmul.f32 %v807_v2, %v399_v42  ;;  %v443_v45 = vstv %s595_s21  ;;  %s581_s29 = sld [smem:[#allocation7 + $0x11]] }
  0x27   :  { %v444_v46 = vmul.f32 %v807_v2, %v443_v45  ;;  %v125_v47 = vstv %s572_s22  ;;  %v445_v49 = vmul.f32 %v817_v11, %v443_v45  ;;  %s567_s6 = sld [smem:[#allocation7 + $0x3]] }
  0x28   :  { %v126_v48 = vmul.f32 %v805_v1, %v125_v47  ;;  %v127_v50 = vmul.f32 %v812_v9, %v125_v47  ;;  %v143_v51 = vstv %s588_s23  ;;  %s893_s7 = sld [smem:[#allocation7 + $0x5]] }
  0x29   :  { %v145_v52 = vmul.f32 %v817_v11, %v143_v51  ;;  %v144_v53 = vmul.f32 %v807_v2, %v143_v51  ;;  %v202_v56 = vstv %s877_s24  ;;  %s568_s9 = sld [smem:[#allocation7 + $0x4]]  ;;  %s760_s24 = smov [#allocation10]  }
  0x2a   :  { %v158_v57 = vstv %s565_s25  ;;  %v203_v59 = vmul.f32 %v805_v1, %v202_v56  ;;  %s896_s1 = sld [smem:[#allocation7 + $0x15]]  ;;  %s548_s25 = sshll.u32 %s760_s24, 4  ;;  %s549_s25 = int_to_ptr.vmem [resolvable:$true] %s548_s25 }
  0x2b   :  { %v218_v58 = vstv %s879_s28  ;;  %v159_v61 = vmul.f32 %v805_v1, %v158_v57  ;;  %v160_v13 = vmul.f32 %v812_v9, %v158_v57  ;;  %s899_s10 = sld [smem:[#allocation7 + $0x14]] }
  0x2c   :  { %256 = vrot.lane.b32.xlu1 %v251_v16, %s750_s8  ;;  %v174_v60 = vstv %s581_s29  ;;  %v219_v63 = vmul.f32 %v807_v2, %v218_v58  ;;  %s916_s11 = sld [smem:[#allocation7 + $0x7]] }
  0x2d   :  { %254 = vrot.lane.b32.xlu0 %v250_v17, %s750_s8  ;;  %v175_v3 = vmul.f32 %v807_v2, %v174_v60  ;;  %v176_v16 = vmul.f32 %v817_v11, %v174_v60  ;;  %v246_v27 = vstv %s567_s6  ;;  %s570_s14 = sld [smem:[#allocation7 + $0x6]] }
  0x2e   :  { %228 = vrot.lane.b32.xlu2 %v224_v19, %s750_s8  ;;  %v247_v29 = vmul.f32 %v805_v1, %v246_v27  ;;  %s918_s15 = sld [smem:[#allocation7 + $0x17]] }
  0x2f   :  { %s586_s16 = sld [smem:[#allocation7 + $0x16]] }
  0x30   :  { %s68_s19 = sld [smem:[#allocation7]] }
  0x31   :  { %v306_v47 = vstv %s899_s10  ;;  %s580_s20 = sld [smem:[#allocation7 + $0x10]] }
  0x32   :  { %v308_v51 = vmul.f32 %v817_v11, %v306_v47 }
  0x34   :  { %298 = vrot.lane.b32.xlu1 %v294_v21, %s750_s8  ;;  %v204_v21 = vmul.f32 %v812_v9, %v202_v56 }
  0x35   :  { %230 = vrot.lane.b32.xlu0 %v225_v22, %s750_s8 }
  0x36   :  { %300 = vrot.lane.b32.xlu2 %v295_v23, %s750_s8 }
  0x3c   :  { %274 = vrot.lane.b32.xlu1 %v269_v25, %s750_s8 }
  0x3d   :  { %272 = vrot.lane.b32.xlu0 %v268_v26, %s750_s8  ;;  %v220_v26 = vmul.f32 %v817_v11, %v218_v58 }
  0x3e   :  { %342 = vrot.lane.b32.xlu2 %v338_v28, %s750_s8  ;;  %v248_v28 = vmul.f32 %v812_v9, %v246_v27 }
  0x44   :  { %316 = vrot.lane.b32.xlu1 %v312_v30, %s750_s8  ;;  %v334_v30 = vstv %s893_s7 }
  0x45   :  { %344 = vrot.lane.b32.xlu0 %v339_v31, %s750_s8 }
  0x46   :  { %318 = vrot.lane.b32.xlu2 %v313_v32, %s750_s8 }
  0x4c   :  { %388 = vrot.lane.b32.xlu1 %v383_v34, %s750_s8 }
  0x4d   :  { %386 = vrot.lane.b32.xlu0 %v382_v35, %s750_s8 }
  0x4e   :  { %360 = vrot.lane.b32.xlu2 %v356_v37, %s750_s8  ;;  %v290_v37 = vstv %s568_s9 }
  0x4f   :  { %v291_v45 = vmul.f32 %v805_v1, %v290_v37 }
  0x54   :  { %430 = vrot.lane.b32.xlu1 %v426_v39, %s750_s8  ;;  %v335_v39 = vmul.f32 %v805_v1, %v334_v30 }
  0x55   :  { %362 = vrot.lane.b32.xlu0 %v357_v40, %s750_s8 }
  0x56   :  { %432 = vrot.lane.b32.xlu2 %v427_v41, %s750_s8  ;;  %v292_v41 = vmul.f32 %v812_v9, %v290_v37 }
  0x5c   :  { %406 = vrot.lane.b32.xlu1 %v401_v43, %s750_s8 }
  0x5d   :  { %404 = vrot.lane.b32.xlu0 %v400_v44, %s750_s8  ;;  %v350_v44 = vstv %s896_s1 }
  0x5e   :  { %448 = vrot.lane.b32.xlu2 %v444_v46, %s750_s8 }
  0x64   :  { %130 = vrot.lane.b32.xlu1 %v126_v48, %s750_s8 }
  0x65   :  { %450 = vrot.lane.b32.xlu0 %v445_v49, %s750_s8  ;;  %v351_v49 = vmul.f32 %v807_v2, %v350_v44 }
  0x66   :  { %132 = vrot.lane.b32.xlu2 %v127_v50, %s750_s8 }
  0x6c   :  { %150 = vrot.lane.b32.xlu1 %v145_v52, %s750_s8 }
  0x6d   :  { %148 = vrot.lane.b32.xlu0 %v144_v53, %s750_s8  ;;  %s583_s8 = sld [smem:[#allocation7 + $0x13]] }
  0x73   :  { %v262_v34 = vstv %s583_s8 }
  0x74   :  { %v264_v40 = vmul.f32 %v817_v11, %v262_v34  ;;  %v263_v43 = vmul.f32 %v807_v2, %v262_v34 }
  0x78   :  { %v185_v54 = vpop.permute.xlu2 %184 }
  0x80   :  { %v187_v55 = vpop.permute.xlu2 %186 }
  0x88   :  { %v229_v62 = vpop.permute.xlu2 %228 }
  0x8e   :  { %v211_v0 = vpop.permute.xlu1 %210 }
  0x8f   :  { %v216_v4 = vadd.f32 %v211_v0, %v203_v59  ;;  %v167_v5 = vpop.permute.xlu0 %166  ;;  %v307_v59 = vmul.f32 %v807_v2, %v306_v47 }
  0x90   :  { %v172_v6 = vadd.f32 %v167_v5, %v159_v61  ;;  %v301_v14 = vpop.permute.xlu2 %300 }
  0x91   :  { %v221_v7 = vadd.f32 %v219_v63, %v216_v4  ;;  %v305_v50 = vadd.f32 %v301_v14, %v292_v41  ;;  %v352_v14 = vmul.f32 %v817_v11, %v350_v44 }
  0x92   :  { %v177_v8 = vadd.f32 %v175_v3, %v172_v6  ;;  %v336_v6 = vmul.f32 %v812_v9, %v334_v30 }
  0x93   :  { %v234_v10 = vadd.f32 %v229_v62, %v221_v7  ;;  %v310_v60 = vadd.f32 %v308_v51, %v305_v50  ;;  %v122_v50 = vstv %s68_s19 }
  0x94   :  { %v190_v12 = vadd.f32 %v185_v54, %v177_v8  ;;  %v124_v51 = vmul.f32 %v812_v9, %v122_v50 }
  0x95   :  { %238 = vrot.lane.b32.xlu1 %v234_v10, %s752_s30  ;;  %v422_v10 = vstv %s916_s11 }
  0x96   :  { %194 = vrot.lane.b32.xlu2 %v190_v12, %s753_s0  ;;  %v213_v15 = vpop.permute.xlu1 %212 }
  0x97   :  { %v169_v17 = vpop.permute.xlu0 %168  ;;  %v217_v25 = vadd.f32 %v213_v15, %v204_v21  ;;  %v378_v15 = vstv %s570_s14 }
  0x98   :  { %v173_v18 = vadd.f32 %v169_v17, %v160_v13  ;;  %v343_v23 = vpop.permute.xlu2 %342  ;;  %v438_v17 = vstv %s918_s15 }
  0x99   :  { %v222_v32 = vadd.f32 %v220_v26, %v217_v25  ;;  %v348_v46 = vadd.f32 %v343_v23, %v335_v39  ;;  %v394_v25 = vstv %s586_s16 }
  0x9a   :  { %v178_v19 = vadd.f32 %v176_v16, %v173_v18  ;;  %v423_v16 = vmul.f32 %v805_v1, %v422_v10  ;;  %v380_v18 = vmul.f32 %v812_v9, %v378_v15  ;;  %v395_v30 = vmul.f32 %v807_v2, %v394_v25 }
  0x9b   :  { %v353_v58 = vadd.f32 %v351_v49, %v348_v46 }
  0x9c   :  { %v191_v20 = vadd.f32 %v187_v55, %v178_v19  ;;  %v379_v19 = vmul.f32 %v805_v1, %v378_v15 }
  0x9e   :  { %196 = vrot.lane.b32.xlu0 %v191_v20, %s753_s0  ;;  %v257_v22 = vpop.permute.xlu1 %256 }
  0x9f   :  { %v255_v24 = vpop.permute.xlu0 %254  ;;  %v261_v38 = vadd.f32 %v257_v22, %v248_v28  ;;  %v439_v22 = vmul.f32 %v807_v2, %v438_v17  ;;  %v396_v28 = vmul.f32 %v817_v11, %v394_v25 }
  0xa0   :  { %v319_v36 = vpop.permute.xlu2 %318  ;;  %v260_v42 = vadd.f32 %v255_v24, %v247_v29 }
  0xa1   :  { %v266_v48 = vadd.f32 %v264_v40, %v261_v38  ;;  %v323_v0 = vadd.f32 %v319_v36, %v310_v60 }
  0xa2   :  { %v265_v53 = vadd.f32 %v263_v43, %v260_v42  ;;  %v440_v42 = vmul.f32 %v817_v11, %v438_v17 }
  0xa6   :  { %v299_v31 = vpop.permute.xlu1 %298 }
  0xa7   :  { %v231_v33 = vpop.permute.xlu0 %230  ;;  %v304_v57 = vadd.f32 %v299_v31, %v291_v45 }
  0xa8   :  { %v235_v35 = vadd.f32 %v231_v33, %v222_v32  ;;  %v361_v61 = vpop.permute.xlu2 %360  ;;  %v424_v33 = vmul.f32 %v812_v9, %v422_v10 }
  0xa9   :  { %v366_v62 = vadd.f32 %v361_v61, %v353_v58  ;;  %v309_v63 = vadd.f32 %v307_v59, %v304_v57 }
  0xaa   :  { %240 = vrot.lane.b32.xlu2 %v235_v35, %s752_s30 }
  0xae   :  { %v275_v52 = vpop.permute.xlu1 %274 }
  0xaf   :  { %v279_v54 = vadd.f32 %v275_v52, %v266_v48  ;;  %v273_v55 = vpop.permute.xlu0 %272  ;;  %v123_v52 = vmul.f32 %v805_v1, %v122_v50  ;;  %v109_v1 = vstv %s953_s2 }
  0xb0   :  { %v278_v56 = vadd.f32 %v273_v55, %v265_v53  ;;  %v433_v12 = vpop.permute.xlu2 %432  ;;  %v138_v53 = vstv %s580_s20 }
  0xb1   :  { %284 = vrot.lane.b32.xlu1 %v279_v54, %s754_s3  ;;  %v437_v40 = vadd.f32 %v433_v12, %v424_v33  ;;  %v139_v58 = vmul.f32 %v807_v2, %v138_v53  ;;  %v140_v59 = vmul.f32 %v817_v11, %v138_v53 }
  0xb2   :  { %282 = vrot.lane.b32.xlu0 %v278_v56, %s754_s3 }
  0xb3   :  { %v442_v43 = vadd.f32 %v440_v42, %v437_v40 }
  0xb6   :  { %v317_v3 = vpop.permute.xlu1 %316 }
  0xb7   :  { %v322_v4 = vadd.f32 %v317_v3, %v309_v63  ;;  %v345_v5 = vpop.permute.xlu0 %344 }
  0xb8   :  { %v349_v13 = vadd.f32 %v345_v5, %v336_v6  ;;  %v449_v32 = vpop.permute.xlu2 %448 }
  0xb9   :  { %370 = vrot.lane.b32.xlu1 %v366_v62, %s755_s12  ;;  %326 = vrot.lane.b32.xlu2 %v322_v4, %s756_s13 }
  0xba   :  { %328 = vrot.lane.b32.xlu0 %v323_v0, %s756_s13  ;;  %v354_v21 = vadd.f32 %v352_v14, %v349_v13 }
  0xbe   :  { %v389_v7 = vpop.permute.xlu1 %388 }
  0xbf   :  { %v387_v8 = vpop.permute.xlu0 %386  ;;  %v393_v27 = vadd.f32 %v389_v7, %v380_v18 }
  0xc0   :  { %v392_v29 = vadd.f32 %v387_v8, %v379_v19  ;;  %v133_v47 = vpop.permute.xlu2 %132 }
  0xc1   :  { %v398_v34 = vadd.f32 %v396_v28, %v393_v27  ;;  %v137_v56 = vadd.f32 %v133_v47, %v124_v51 }
  0xc2   :  { %v397_v36 = vadd.f32 %v395_v30, %v392_v29  ;;  %v106_v30 = vld [vmem:[#allocation8 + $0x18] sm:$0x7] }
  0xc3   :  { %v142_v62 = vadd.f32 %v140_v59, %v137_v56  ;;  %v652_v56 = vld [vmem:[%s955_s4] ss:$0 sm:$0xff] }
  0xc6   :  { %v431_v20 = vpop.permute.xlu1 %430 }
  0xc7   :  { %v436_v23 = vadd.f32 %v431_v20, %v423_v16  ;;  %v363_v24 = vpop.permute.xlu0 %362 }
  0xc8   :  { %v367_v26 = vadd.f32 %v363_v24, %v354_v21 }
  0xc9   :  { %v441_v31 = vadd.f32 %v439_v22, %v436_v23 }
  0xca   :  { %372 = vrot.lane.b32.xlu2 %v367_v26, %s755_s12 }
  0xcb   :  { %v454_v37 = vadd.f32 %v449_v32, %v441_v31  ;;  %v509_v31 = vunpack.c.l.b16 %v106_v30  ;;  %v759_v32 = vmov 65535  }
  0xcc   :  { %v523_v33 = vsel %vm521_vm0, 4294967295, %v759_v32 }
  0xce   :  { %v407_v35 = vpop.permute.xlu1 %406 }
  0xcf   :  { %v411_v38 = vadd.f32 %v407_v35, %v398_v34  ;;  %v405_v39 = vpop.permute.xlu0 %404  ;;  %v524_v34 = vsel %vm522_vm1, %v523_v33, 0  ;;  %v513_v35 = vpack.c.b16 %v509_v31, %v509_v31 }
  0xd0   :  { %v410_v41 = vadd.f32 %v405_v39, %v397_v36  ;;  %v609_v39 = vld [vmem:[#allocation8] sm:$0xff] }
  0xd1   :  { %416 = vrot.lane.b32.xlu1 %v411_v38, %s757_s17  ;;  %v526_v36 = vand.u32 %v524_v34, %v513_v35  ;;  %v610_v38 = vld [vmem:[#allocation8 + $0x8] sm:$0xff] }
  0xd2   :  { %414 = vrot.lane.b32.xlu0 %v410_v41, %s757_s17  ;;  %458 = vrot.lane.b32.xlu2 %v454_v37, %s758_s18  ;;  %v611_v37 = vld [vmem:[#allocation8 + $0x10] sm:$0xff] }
  0xd3   :  { %532 = vmatpush.bf16.msra.mxu0 %v526_v36 }
  0xd6   :  { %v131_v46 = vpop.permute.xlu1 %130 }
  0xd7   :  { %v451_v44 = vpop.permute.xlu0 %450  ;;  %v136_v57 = vadd.f32 %v131_v46, %v123_v52  ;;  %533 = vmatpush.bf16.msra.mxu0 %v611_v37 }
  0xd8   :  { %v455_v45 = vadd.f32 %v451_v44, %v442_v43 }
  0xd9   :  { %v141_v61 = vadd.f32 %v139_v58, %v136_v57 }
  0xda   :  { %460 = vrot.lane.b32.xlu0 %v455_v45, %s758_s18 }
  0xdb   :  { %534 = vmatpush.bf16.msra.mxu0 %v610_v38 }
  0xde   :  { %v151_v49 = vpop.permute.xlu1 %150 }
  0xdf   :  { %v149_v48 = vpop.permute.xlu0 %148  ;;  %v155_v4 = vadd.f32 %v151_v49, %v142_v62  ;;  %535 = vmatpush.bf16.msra.mxu0 %v609_v39 }
  0xe0   :  { %v154_v3 = vadd.f32 %v149_v48, %v141_v61 }
  0xe1   :  { %v157_v6 = vadd.f32 %v155_v4, %v109_v1 }
  0xe2   :  { %v156_v5 = vadd.f32 %v154_v3, %v109_v1 }
  0xf0   :  { %v195_v55 = vpop.permute.xlu2 %194 }
  0xf1   :  { %v200_v10 = vadd.f32 %v195_v55, %v156_v5 }
 0x104   :  { %v241_v0 = vpop.permute.xlu2 %240 }
 0x107   :  { %v239_v60 = vpop.permute.xlu1 %238 }
 0x108   :  { %v244_v12 = vadd.f32 %v239_v60, %v200_v10 }
 0x110   :  { %v197_v54 = vpop.permute.xlu0 %196 }
 0x111   :  { %v201_v2 = vadd.f32 %v197_v54, %v157_v6 }
 0x113   :  { %v327_v7 = vpop.permute.xlu2 %326  ;;  %v245_v13 = vadd.f32 %v241_v0, %v201_v2 }
 0x123   :  { %v285_v9 = vpop.permute.xlu1 %284 }
 0x124   :  { %v283_v63 = vpop.permute.xlu0 %282  ;;  %v289_v15 = vadd.f32 %v285_v9, %v245_v13  ;;  %v373_v16 = vpop.permute.xlu2 %372 }
 0x125   :  { %v288_v14 = vadd.f32 %v283_v63, %v244_v12 }
 0x127   :  { %v332_v18 = vadd.f32 %v327_v7, %v288_v14 }
 0x12b   :  { %v371_v11 = vpop.permute.xlu1 %370 }
 0x12c   :  { %v329_v8 = vpop.permute.xlu0 %328  ;;  %v376_v20 = vadd.f32 %v371_v11, %v332_v18  ;;  %v459_v25 = vpop.permute.xlu2 %458 }
 0x12d   :  { %v333_v19 = vadd.f32 %v329_v8, %v289_v15 }
 0x12f   :  { %v377_v22 = vadd.f32 %v373_v16, %v333_v19 }
 0x143   :  { %v417_v21 = vpop.permute.xlu1 %416 }
 0x144   :  { %v415_v17 = vpop.permute.xlu0 %414  ;;  %v421_v24 = vadd.f32 %v417_v21, %v377_v22 }
 0x145   :  { %v420_v23 = vadd.f32 %v415_v17, %v376_v20 }
 0x147   :  { %v464_v27 = vadd.f32 %v459_v25, %v420_v23 }
 0x14c   :  { %v461_v26 = vpop.permute.xlu0 %460 }
 0x14d   :  { %v465_v28 = vadd.f32 %v461_v26, %v421_v24 }
 0x14f   :  { %v647_v29 = vpack.i.bf16 %v465_v28, %v464_v27 }
 0x151   :  { %648 = vrot.lane.b32.xlu0 %v647_v29, %s754_s3  ;;  %643 = vrot.lane.b32.xlu2 %v647_v29, %s752_s30  ;;  %s550_s30 = sshll.u32 %s956_s5, 4  ;;  %s551_s30 = int_to_ptr.hbm [resolvable:$true] %s550_s30 }
 0x152   :  { %638 = vrot.lane.b32.xlu1 %v647_v29, %s753_s0 }
 0x1ab   :  { %v644_v40 = vpop.permute.xlu2 %643 }
 0x1ac   :  { %v646_v45 = vunpack.i.h.bf16 %v644_v40  ;;  %v645_v46 = vunpack.i.l.bf16 %v644_v40 }
 0x1c3   :  { %v649_v44 = vpop.permute.xlu0 %648 }
 0x1c4   :  { %v639_v41 = vpop.permute.xlu1 %638  ;;  %v651_v49 = vunpack.i.h.bf16 %v649_v44  ;;  %v650_v50 = vunpack.i.l.bf16 %v649_v44 }
 0x1c5   :  { %v641_v42 = vunpack.i.h.bf16 %v639_v41  ;;  %v640_v43 = vunpack.i.l.bf16 %v639_v41 }
 0x1c7   :  { %v475_v47 = vmax.f32 %v465_v28, %v641_v42  ;;  %v474_v48 = vmax.f32 %v464_v27, %v640_v43 }
 0x1c9   :  { %v483_v51 = vmax.f32 %v475_v47, %v646_v45  ;;  %v482_v52 = vmax.f32 %v474_v48, %v645_v46 }
 0x1cb   :  { %v490_v53 = vmax.f32 %v482_v52, %v650_v50  ;;  %v491_v54 = vmax.f32 %v483_v51, %v651_v49 }
 0x1cd   :  { %v492_v55 = vpack.c.bf16 %v491_v54, %v490_v53 }
 0x1cf   :  { %608 = vmatmul.msk.bf16.vlgmr.msra.gmra.mxu0 %vm517_vm2, %v492_v55 }
 0x24c   :  { %v537_v57 = vpop.f32.mrf.mxu0 }
 0x24d   :  { %v538_v58 = vadd.f32 %v652_v56, %v537_v57 }
 0x24f   :  { %542 = vst [vmem:[#allocation10] sm:$0xff] %v538_v58 }
 0x254   :  { %v539_v59 = vpop.f32.mrf.mxu0 }
 0x255   :  { %v540_v60 = vadd.f32 %v652_v56, %v539_v59 }
 0x257   :  { %543 = vst [vmem:[#allocation10 + $0x8] sm:$0xff] %v540_v60 }
 0x258   :  { %556 = dma.vmem_to_hbm [thread:$0]  %s549_s25, 256, %s551_s30, [#allocation5], %s746_s26, %s746_s26, %s747_s27  }
 0x259   :  { %743 = dma.done.wait [#allocation5], 256  }
 0x25a   :  { %744 = vsyncadd [#allocation5], 4294967040 }
 0x25b   :  { %561 = vsyncpa [#allocation4], 1 }
 0x25c   :  { %562 = vsyncpa [#allocation9], 1 }
 0x25d   :  { %563 = vsyncpa [#allocation5], 1 }
 0x25e   :  { %564 = vsyncpa [#allocation6], 1 }

</bundles_post_ra>
